<compile_context>
chip_gen: v6e
topology: v6e:2x2x1
jax: 0.10.0
libtpu: 0.0.40
codegen_flags: <defaults>
</compile_context>

<pallas_src>
import functools

import jax
import jax.numpy as jnp
from jax import lax
from jax.experimental import pallas as pl
from jax.experimental.pallas import tpu as pltpu


def _conv3x3_relu_kernel(x_ref, w_ref, b_ref, m_ref, o_ref, xpad_ref, patches_ref,
                         *, H, W, Cin, Cout, B_tile, pad):
    # x_ref:       (B_tile, Cin, H*W)   flat NCHW images (lane index = h*W + w)
    # w_ref:       (Cout, 9*Cin)        weights, K-ordered as (kh*3+kw)*Cin + c
    # b_ref:       (Cout, 1)            bias
    # m_ref:       (2, H*W)             edge masks: [0] kills w==0, [1] kills w==W-1
    # o_ref:       (B_tile, Cout, H*W)  output (already NCHW, lane-dense)
    # xpad_ref:    (Cin, 2*pad + H*W)   zero-bordered staging scratch
    # patches_ref: (9*Cin, H*W)         im2col operand
    HW = H * W

    # Borders are never overwritten below, so zero the halo scratch once per step.
    xpad_ref[...] = jnp.zeros_like(xpad_ref)

    w_mat = w_ref[...]            # (Cout, 9*Cin), block index is constant -> resident
    bias = b_ref[...]             # (Cout, 1) broadcasts over the lane axis
    mask_l = m_ref[0:1, :]        # (1, HW): 0.0 where w == 0      (dw = -1 wrap)
    mask_r = m_ref[1:2, :]        # (1, HW): 0.0 where w == W - 1  (dw = +1 wrap)

    for b in range(B_tile):       # static, unrolled
        # Stage image b into the padded scratch; interior start `pad` is a
        # multiple of 128, so this is an aligned, unmasked store.
        xpad_ref[:, pad:pad + HW] = x_ref[b]

        # im2col in VMEM: 9 lane-shifted copies -> one (9*Cin, HW) operand.
        # Row-out-of-range taps read the zero border; column wrap is masked.
        for kh in range(3):
            for kw in range(3):
                d = (kh - 1) * W + (kw - 1)
                tap = xpad_ref[:, pad + d:pad + d + HW]      # (Cin, HW)
                if kw == 0:
                    tap = tap * mask_l
                elif kw == 2:
                    tap = tap * mask_r
                t = kh * 3 + kw
                patches_ref[t * Cin:(t + 1) * Cin, :] = tap

        # One MXU matmul with K = 9*Cin; lane-dense (Cout, HW) accumulator.
        acc = jnp.dot(w_mat, patches_ref[...],
                      preferred_element_type=jnp.float32)     # (Cout, HW) f32
        acc = acc + bias
        o_ref[b] = jnp.maximum(acc, 0.0).astype(o_ref.dtype)  # ReLU, full-width store


def convolution_block(x_nchw, weight, bias, *, batch_tile=None):
    """Forward pass of convolutionBlock (Conv2d(k=3, padding=1) + ReLU).

    x_nchw : (N, Cin, H, W)   float32, PyTorch NCHW layout
    weight : (Cout, Cin, 3, 3) PyTorch Conv2d weight layout
    bias   : (Cout,)
    returns: (N, Cout, H, W)
    """
    N, Cin, H, W = x_nchw.shape
    Cout = weight.shape[0]
    assert weight.shape == (Cout, Cin, 3, 3)
    HW = H * W

    # --- free layout glue (reshapes of contiguous arrays; no HBM transpose passes) ---
    x_flat = x_nchw.reshape(N, Cin, HW)
    # w_mat[co, (kh*3+kw)*Cin + c] = weight[co, c, kh, kw]  (tiny parameter transform)
    w_mat = jnp.transpose(weight, (0, 2, 3, 1)).reshape(Cout, 9 * Cin)
    b_col = bias.reshape(Cout, 1)

    # Tiny constant column-validity masks (depend only on W).
    col = jnp.arange(HW, dtype=jnp.int32) % W
    edge_mask = jnp.stack([col != 0, col != W - 1]).astype(x_nchw.dtype)   # (2, HW)

    # Batch images per grid step: enough work to amortize per-step pipeline
    # overhead, but keep >= 2 parallel grid steps so both v7x TensorCores run.
    if batch_tile is None:
        bytes_per_image = (Cin + Cout) * HW * x_nchw.dtype.itemsize
        batch_tile = max(1, min(N, (2 * 1024 * 1024) // max(bytes_per_image, 1)))
        while batch_tile > 1 and (N % batch_tile or N // batch_tile < 2):
            batch_tile -= 1
    assert N % batch_tile == 0

    # Lane-aligned halo: >= W+1 zeros on each side of the flat image.
    pad = -(-(W + 1) // 128) * 128

    kernel = functools.partial(
        _conv3x3_relu_kernel,
        H=H, W=W, Cin=Cin, Cout=Cout, B_tile=batch_tile, pad=pad)

    out_flat = pl.pallas_call(
        kernel,
        out_shape=jax.ShapeDtypeStruct((N, Cout, HW), x_nchw.dtype),
        grid_spec=pltpu.PrefetchScalarGridSpec(
            num_scalar_prefetch=0,
            grid=(N // batch_tile,),
            in_specs=[
                pl.BlockSpec((batch_tile, Cin, HW), lambda n: (n, 0, 0)),
                pl.BlockSpec((Cout, 9 * Cin), lambda n: (0, 0)),
                pl.BlockSpec((Cout, 1), lambda n: (0, 0)),
                pl.BlockSpec((2, HW), lambda n: (0, 0)),
            ],
            out_specs=pl.BlockSpec((batch_tile, Cout, HW), lambda n: (n, 0, 0)),
            scratch_shapes=[
                pltpu.VMEM((Cin, 2 * pad + HW), x_nchw.dtype),   # padded image
                pltpu.VMEM((9 * Cin, HW), x_nchw.dtype),         # im2col operand
            ],
        ),
        compiler_params=pltpu.CompilerParams(
            dimension_semantics=("parallel",),
            vmem_limit_bytes=32 * 1024 * 1024,
        ),
    )(x_flat, w_mat, b_col, edge_mask)

    return out_flat.reshape(N, Cout, H, W)      # free reshape: already NCHW


if __name__ == "__main__":
    key = jax.random.PRNGKey(0)
    k_x, k_w, k_b = jax.random.split(key, 3)

    N, Cin, H, W = 2, 4, 16, 16
    Cout = 8

    x = jax.random.normal(k_x, (N, Cin, H, W), dtype=jnp.float32)
    fan_in = Cin * 3 * 3
    bound = 1.0 / (fan_in ** 0.5)
    weight = jax.random.uniform(k_w, (Cout, Cin, 3, 3), jnp.float32, -bound, bound)
    bias = jax.random.uniform(k_b, (Cout,), jnp.float32, -bound, bound)

    conv_fn = jax.jit(convolution_block)
    out = conv_fn(x, weight, bias)
    out = jax.block_until_ready(out)

    # Reference: XLA conv (NCHW, padding=1) + bias + ReLU.
    ref = lax.conv_general_dilated(
        x, weight, window_strides=(1, 1), padding=((1, 1), (1, 1)),
        dimension_numbers=("NCHW", "OIHW", "NCHW"))
    ref = jnp.maximum(ref + bias[None, :, None, None], 0.0)

    assert out.shape == (N, Cout, H, W)
    assert jnp.allclose(out, ref, atol=1e-5, rtol=1e-5)

    print("KERNEL_OK")
</pallas_src>

<mosaic_0001>
module attributes {stable_mosaic.version = 11 : i64} {
  func.func @_conv3x3_relu_kernel(%arg0: i32, %arg1: memref<1x4x256xf32, #tpu.memory_space<vmem>>, %arg2: memref<8x36xf32, #tpu.memory_space<vmem>>, %arg3: memref<8x1xf32, #tpu.memory_space<vmem>>, %arg4: memref<2x256xf32, #tpu.memory_space<vmem>>, %arg5: memref<1x8x256xf32, #tpu.memory_space<vmem>>, %arg6: memref<4x512xf32, #tpu.memory_space<vmem>>, %arg7: memref<36x256xf32, #tpu.memory_space<vmem>>) attributes {dimension_semantics = [#tpu.dimension_semantics<parallel>], iteration_bounds = array<i64: 2>, scalar_prefetch = 0 : i64, scratch_operands = 2 : i64, tpu.core_type = #tpu.core_type<tc>, window_params = [{transform_indices = @transform_0, window_bounds = array<i64: 1, 4, 256>}, {pipeline_mode = #tpu.pipeline_mode<synchronous>, transform_indices = @transform_1, window_bounds = array<i64: 8, 36>}, {pipeline_mode = #tpu.pipeline_mode<synchronous>, transform_indices = @transform_2, window_bounds = array<i64: 8, 1>}, {pipeline_mode = #tpu.pipeline_mode<synchronous>, transform_indices = @transform_3, window_bounds = array<i64: 2, 256>}, {transform_indices = @transform_4, window_bounds = array<i64: 1, 8, 256>}]} {
    %cst = arith.constant 0.000000e+00 : f32
    %0 = vector.broadcast %cst : f32 to vector<4x512xf32>
    %c0 = arith.constant 0 : index
    %c0_0 = arith.constant 0 : index
    %1 = vector.load %arg6[%c0, %c0_0] : memref<4x512xf32, #tpu.memory_space<vmem>>, vector<4x512xf32>
    tpu.vector_store %arg6[%c0, %c0_0], %0 {strides = array<i32>} : memref<4x512xf32, #tpu.memory_space<vmem>>, vector<4x512xf32>,
    %c0_1 = arith.constant 0 : index
    %c0_2 = arith.constant 0 : index
    %2 = vector.load %arg2[%c0_1, %c0_2] : memref<8x36xf32, #tpu.memory_space<vmem>>, vector<8x36xf32>
    %c0_3 = arith.constant 0 : index
    %c0_4 = arith.constant 0 : index
    %3 = vector.load %arg3[%c0_3, %c0_4] : memref<8x1xf32, #tpu.memory_space<vmem>>, vector<8x1xf32>
    %c0_5 = arith.constant 0 : index
    %c0_6 = arith.constant 0 : index
    %4 = vector.load %arg4[%c0_5, %c0_6] : memref<2x256xf32, #tpu.memory_space<vmem>>, vector<1x256xf32>
    %c1 = arith.constant 1 : index
    %c0_7 = arith.constant 0 : index
    %5 = vector.load %arg4[%c1, %c0_7] : memref<2x256xf32, #tpu.memory_space<vmem>>, vector<1x256xf32>
    %c0_8 = arith.constant 0 : index
    %c0_9 = arith.constant 0 : index
    %c0_10 = arith.constant 0 : index
    %6 = vector.load %arg1[%c0_8, %c0_9, %c0_10] : memref<1x4x256xf32, #tpu.memory_space<vmem>>, vector<1x4x256xf32>
    %7 = vector.shape_cast %6 : vector<1x4x256xf32> to vector<4x256xf32>
    %c0_11 = arith.constant 0 : index
    %c128 = arith.constant 128 : index
    %8 = vector.load %arg6[%c0_11, %c128] : memref<4x512xf32, #tpu.memory_space<vmem>>, vector<4x256xf32>
    tpu.vector_store %arg6[%c0_11, %c128], %7 {strides = array<i32>} : memref<4x512xf32, #tpu.memory_space<vmem>>, vector<4x256xf32>,
    %c0_12 = arith.constant 0 : index
    %c111 = arith.constant 111 : index
    %9 = vector.load %arg6[%c0_12, %c111] : memref<4x512xf32, #tpu.memory_space<vmem>>, vector<4x256xf32>
    %10 = vector.broadcast %4 : vector<1x256xf32> to vector<4x256xf32>
    %11 = arith.mulf %9, %10 : vector<4x256xf32>
    %c0_13 = arith.constant 0 : index
    %c0_14 = arith.constant 0 : index
    %12 = vector.load %arg7[%c0_13, %c0_14] : memref<36x256xf32, #tpu.memory_space<vmem>>, vector<4x256xf32>
    tpu.vector_store %arg7[%c0_13, %c0_14], %11 {strides = array<i32>} : memref<36x256xf32, #tpu.memory_space<vmem>>, vector<4x256xf32>,
    %c0_15 = arith.constant 0 : index
    %c112 = arith.constant 112 : index
    %13 = vector.load %arg6[%c0_15, %c112] : memref<4x512xf32, #tpu.memory_space<vmem>>, vector<4x256xf32>
    %c4 = arith.constant 4 : index
    %c0_16 = arith.constant 0 : index
    %14 = vector.load %arg7[%c4, %c0_16] : memref<36x256xf32, #tpu.memory_space<vmem>>, vector<4x256xf32>
    tpu.vector_store %arg7[%c4, %c0_16], %13 {strides = array<i32>} : memref<36x256xf32, #tpu.memory_space<vmem>>, vector<4x256xf32>,
    %c0_17 = arith.constant 0 : index
    %c113 = arith.constant 113 : index
    %15 = vector.load %arg6[%c0_17, %c113] : memref<4x512xf32, #tpu.memory_space<vmem>>, vector<4x256xf32>
    %16 = vector.broadcast %5 : vector<1x256xf32> to vector<4x256xf32>
    %17 = arith.mulf %15, %16 : vector<4x256xf32>
    %c8 = arith.constant 8 : index
    %c0_18 = arith.constant 0 : index
    %18 = vector.load %arg7[%c8, %c0_18] : memref<36x256xf32, #tpu.memory_space<vmem>>, vector<4x256xf32>
    tpu.vector_store %arg7[%c8, %c0_18], %17 {strides = array<i32>} : memref<36x256xf32, #tpu.memory_space<vmem>>, vector<4x256xf32>,
    %c0_19 = arith.constant 0 : index
    %c127 = arith.constant 127 : index
    %19 = vector.load %arg6[%c0_19, %c127] : memref<4x512xf32, #tpu.memory_space<vmem>>, vector<4x256xf32>
    %20 = vector.broadcast %4 : vector<1x256xf32> to vector<4x256xf32>
    %21 = arith.mulf %19, %20 : vector<4x256xf32>
    %c12 = arith.constant 12 : index
    %c0_20 = arith.constant 0 : index
    %22 = vector.load %arg7[%c12, %c0_20] : memref<36x256xf32, #tpu.memory_space<vmem>>, vector<4x256xf32>
    tpu.vector_store %arg7[%c12, %c0_20], %21 {strides = array<i32>} : memref<36x256xf32, #tpu.memory_space<vmem>>, vector<4x256xf32>,
    %c0_21 = arith.constant 0 : index
    %c128_22 = arith.constant 128 : index
    %23 = vector.load %arg6[%c0_21, %c128_22] : memref<4x512xf32, #tpu.memory_space<vmem>>, vector<4x256xf32>
    %c16 = arith.constant 16 : index
    %c0_23 = arith.constant 0 : index
    %24 = vector.load %arg7[%c16, %c0_23] : memref<36x256xf32, #tpu.memory_space<vmem>>, vector<4x256xf32>
    tpu.vector_store %arg7[%c16, %c0_23], %23 {strides = array<i32>} : memref<36x256xf32, #tpu.memory_space<vmem>>, vector<4x256xf32>,
    %c0_24 = arith.constant 0 : index
    %c129 = arith.constant 129 : index
    %25 = vector.load %arg6[%c0_24, %c129] : memref<4x512xf32, #tpu.memory_space<vmem>>, vector<4x256xf32>
    %26 = vector.broadcast %5 : vector<1x256xf32> to vector<4x256xf32>
    %27 = arith.mulf %25, %26 : vector<4x256xf32>
    %c20 = arith.constant 20 : index
    %c0_25 = arith.constant 0 : index
    %28 = vector.load %arg7[%c20, %c0_25] : memref<36x256xf32, #tpu.memory_space<vmem>>, vector<4x256xf32>
    tpu.vector_store %arg7[%c20, %c0_25], %27 {strides = array<i32>} : memref<36x256xf32, #tpu.memory_space<vmem>>, vector<4x256xf32>,
    %c0_26 = arith.constant 0 : index
    %c143 = arith.constant 143 : index
    %29 = vector.load %arg6[%c0_26, %c143] : memref<4x512xf32, #tpu.memory_space<vmem>>, vector<4x256xf32>
    %30 = vector.broadcast %4 : vector<1x256xf32> to vector<4x256xf32>
    %31 = arith.mulf %29, %30 : vector<4x256xf32>
    %c24 = arith.constant 24 : index
    %c0_27 = arith.constant 0 : index
    %32 = vector.load %arg7[%c24, %c0_27] : memref<36x256xf32, #tpu.memory_space<vmem>>, vector<4x256xf32>
    tpu.vector_store %arg7[%c24, %c0_27], %31 {strides = array<i32>} : memref<36x256xf32, #tpu.memory_space<vmem>>, vector<4x256xf32>,
    %c0_28 = arith.constant 0 : index
    %c144 = arith.constant 144 : index
    %33 = vector.load %arg6[%c0_28, %c144] : memref<4x512xf32, #tpu.memory_space<vmem>>, vector<4x256xf32>
    %c28 = arith.constant 28 : index
    %c0_29 = arith.constant 0 : index
    %34 = vector.load %arg7[%c28, %c0_29] : memref<36x256xf32, #tpu.memory_space<vmem>>, vector<4x256xf32>
    tpu.vector_store %arg7[%c28, %c0_29], %33 {strides = array<i32>} : memref<36x256xf32, #tpu.memory_space<vmem>>, vector<4x256xf32>,
    %c0_30 = arith.constant 0 : index
    %c145 = arith.constant 145 : index
    %35 = vector.load %arg6[%c0_30, %c145] : memref<4x512xf32, #tpu.memory_space<vmem>>, vector<4x256xf32>
    %36 = vector.broadcast %5 : vector<1x256xf32> to vector<4x256xf32>
    %37 = arith.mulf %35, %36 : vector<4x256xf32>
    %c32 = arith.constant 32 : index
    %c0_31 = arith.constant 0 : index
    %38 = vector.load %arg7[%c32, %c0_31] : memref<36x256xf32, #tpu.memory_space<vmem>>, vector<4x256xf32>
    tpu.vector_store %arg7[%c32, %c0_31], %37 {strides = array<i32>} : memref<36x256xf32, #tpu.memory_space<vmem>>, vector<4x256xf32>,
    %c0_32 = arith.constant 0 : index
    %c0_33 = arith.constant 0 : index
    %39 = vector.load %arg7[%c0_32, %c0_33] : memref<36x256xf32, #tpu.memory_space<vmem>>, vector<36x256xf32>
    %cst_34 = arith.constant dense<0.000000e+00> : vector<8x256xf32>
    %40 = tpu.matmul %2, %39, %cst_34 {dimension_numbers = #tpu.dot_dimension_numbers<[1], [0], [0], [1], [0, 0, 1, 1], [], []>} : vector<8x36xf32>, vector<36x256xf32>, vector<8x256xf32> -> vector<8x256xf32>
    %41 = vector.broadcast %3 : vector<8x1xf32> to vector<8x256xf32>
    %42 = arith.addf %40, %41 : vector<8x256xf32>
    %cst_35 = arith.constant 0.000000e+00 : f32
    %43 = vector.broadcast %cst_35 : f32 to vector<8x256xf32>
    %44 = arith.maximumf %42, %43 : vector<8x256xf32>
    %c0_36 = arith.constant 0 : index
    %c0_37 = arith.constant 0 : index
    %c0_38 = arith.constant 0 : index
    %45 = vector.load %arg5[%c0_36, %c0_37, %c0_38] : memref<1x8x256xf32, #tpu.memory_space<vmem>>, vector<1x8x256xf32>
    %46 = vector.shape_cast %45 : vector<1x8x256xf32> to vector<8x256xf32>
    %47 = vector.shape_cast %44 : vector<8x256xf32> to vector<1x8x256xf32>
    tpu.vector_store %arg5[%c0_36, %c0_37, %c0_38], %47 {strides = array<i32>} : memref<1x8x256xf32, #tpu.memory_space<vmem>>, vector<1x8x256xf32>,
    return
  }
  func.func @transform_0(%arg0: i32) -> (i32, i32, i32) {
    %c0_i32 = arith.constant 0 : i32
    %c0_i32_0 = arith.constant 0 : i32
    %c0_i32_1 = arith.constant 0 : i32
    return %arg0, %c0_i32, %c0_i32_0 : i32, i32, i32
  }
  func.func @transform_1(%arg0: i32) -> (i32, i32) {
    %c0_i32 = arith.constant 0 : i32
    %c0_i32_0 = arith.constant 0 : i32
    %c0_i32_1 = arith.constant 0 : i32
    return %c0_i32, %c0_i32_0 : i32, i32
  }
  func.func @transform_2(%arg0: i32) -> (i32, i32) {
    %c0_i32 = arith.constant 0 : i32
    %c0_i32_0 = arith.constant 0 : i32
    %c0_i32_1 = arith.constant 0 : i32
    return %c0_i32, %c0_i32_0 : i32, i32
  }
  func.func @transform_3(%arg0: i32) -> (i32, i32) {
    %c0_i32 = arith.constant 0 : i32
    %c0_i32_0 = arith.constant 0 : i32
    %c0_i32_1 = arith.constant 0 : i32
    return %c0_i32, %c0_i32_0 : i32, i32
  }
  func.func @transform_4(%arg0: i32) -> (i32, i32, i32) {
    %c0_i32 = arith.constant 0 : i32
    %c0_i32_0 = arith.constant 0 : i32
    %c0_i32_1 = arith.constant 0 : i32
    return %arg0, %c0_i32, %c0_i32_0 : i32, i32, i32
  }
}

</mosaic_0001>

<bundles_post_ra>
// kernel: convolution_block.1
= control target key start
LH: loop header
LB: loop body
LE: loop exit
PB: predicated region body
PF: predicated region fallthrough
CT: control target
= control target key end

     0   :  { %s669_s15 = smov 0   ;;  %s775_s0 = inlined_call_operand.vmem [shape: f32[2,4,256], index: 0, kind: input, shape index: {}]   ;;  %s776_s1 = inlined_call_operand.vmem [shape: f32[8,36], index: 1, kind: input, shape index: {}]   ;;  %s777_s2 = inlined_call_operand.vmem [shape: f32[8,1], index: 2, kind: input, shape index: {}]   ;;  %s778_s3 = inlined_call_operand.vmem [shape: f32[2,256], index: 3, kind: input, shape index: {}]   ;;  %s779_s4 = inlined_call_operand.vmem [shape: f32[2,8,256], index: 4, kind: output, shape index: {}]  }
   0x1 LB: > { %s585_s16 = sadd.s32 4294967295, %s632_s15   ;;  %p589_p0 = scmp.ge.s32.totalorder %s632_s15, 1  ;;  %s632_s15 = sphi %s669_s15, %s14_s15  }
   0x2   : > { %p162_p1 = scmp.lt.s32.totalorder %s632_s15, 3 }
   0x4   : > { %p163_p2 = pnand %p589_p0, %p162_p1 }
   0x5   : > { %p188_p3 = scmp.lt.s32.totalorder (!%p163_p2), %s585_s16, 1  ;;  %s635_s25 = smov (!%p163_p2), 1  }
   0x6   : > { %166 = sbr.rel (%p163_p2) target bundleno = 501 (0x1f5), region = 36  ;;  %s636_s26 = smov (!%p163_p2), 17  }
   0x7   : > { %s637_s27 = smov (!%p163_p2), 113   ;;  %s638_s28 = smov (!%p163_p2), 15  }
   0x8   : > { %s639_s29 = smov (!%p163_p2), 111   ;;  %s640_s30 = smov (!%p163_p2), 127  }
   0x9   : > { %s641_s5 = smov (!%p163_p2), 112   ;;  %s642_s6 = smov (!%p163_p2), 16  }
   0xb   : > { %v210_v0 = vlaneseq  ;;  %v634_v1 = vmov 0.0   ;;  %v594_v2 = vld [vmem:[%s778_s3 + $0x1] ss:$2 sm:$0x3]  ;;  %s781_s16 = smov (!%p188_p3, %s585_s16), 1  ;;  %vm237_vm0 = vcmask 138240  }
   0xc   : > { %199 = vst [vmem:[#allocation2 + $0x8] sm:$0xff] %v634_v1  ;;  %198 = vst [vmem:[#allocation2] sm:$0xff] %v634_v1  ;;  %519 = vmatprep.mubr.f32.mxu0 %v634_v1  ;;  %v202_v4 = vld [vmem:[%s778_s3] ss:$2 sm:$0x3]  ;;  %s600_s21 = sshll.u32 %s781_s16, 3 }
   0xd   : > { %v211_v3 = vshrl.u32 %v210_v0, 7  ;;  %s192_s24 = scalar_lea.vmem %s775_s0, %s600_s21  ;;  %vm293_vm1 = vcmask 121856   ;;  %vm305_vm2 = vcmask 1039360   ;;  %vm397_vm3 = vcmask 916480   ;;  %s601_s11 = sshll.u32 %s781_s16, 4 }
   0xe   : > { %v689_v12 = vld [vmem:[%s192_s24] sm:$0xff]  ;;  %vm321_vm4 = vcmask 7168   ;;  %vm278_vm5 = vcmask 924672   ;;  %vm256_vm6 = vcmask 130048   ;;  %vm222_vm7 = vcmask 908288   ;;  %s197_s14 = scalar_lea.vmem %s779_s4, %s601_s11 }
   0xf   : > { %v212_v5 = vsub.s32 0, %v211_v3  ;;  %v216_v6 = vsub.s32 1, %v211_v3  ;;  %206 = vst [vmem:[#allocation2 + $0x4] sm:$0xff] %v689_v12  ;;  %332 = vst [vmem:[#allocation3 + $0x48] sm:$0xf] %v689_v12  ;;  %v389_v15 = vcombine.low %v689_v12, %v689_v12  ;;  %v330_v44 = vcombine.high %v689_v12, %v689_v12 }
  0x10   : > { %vm448_vm8 = vcmask 1043456   ;;  %vm444_vm9 = vcmask 293888  }
  0x11   : > { %v269_v7 = vrot.slane %v594_v2, %v212_v5  ;;  %v273_v8 = vrot.slane %v594_v2, %v216_v6  ;;  %v213_v9 = vrot.slane %v202_v4, %v212_v5  ;;  %v217_v10 = vrot.slane %v202_v4, %v216_v6  ;;  %333 = vst [vmem:[#allocation3 + $0x28] sm:$0xf] %v330_v44 }
  0x13   : > { %v274_v11 = vcombine.low %v269_v7, %v273_v8  ;;  %v218_v13 = vcombine.low %v213_v9, %v217_v10  ;;  %v621_v14 = vld [vmem:[#allocation2 + $0xc] ss:$0 sps:$4 sm:$0xff]   ;;  %v643_v8 = vmov 0   ;;  %v201_v9 = vld [vmem:[%s777_s2] sm:$0xff] }
  0x14   : > { %v405_v20 = vld [vmem:[#allocation2 + $0xc] sm:$0xf]  ;;  %620 = vset.pattern.permute.xlu0 %v643_v8 }
  0x15   : > { %336 = vrot.lane.b32.xlu1 %v274_v11, %s635_s25  ;;  %406 = vrot.lane.b32.xlu0 %v274_v11, %s636_s26  ;;  %v361_v26 = vld [vmem:[#allocation2 + $0xc] sm:$0xf] }
  0x16   : > { %v623_v16 = vld [vmem:[#allocation2 + $0x8] ss:$0 sps:$4 sm:$0xff]   ;;  %v703_v17 = vld [vmem:[#allocation2] sm:$0xff]  ;;  %v335_v48 = vld [vmem:[#allocation2 + $0xc] sm:$0xf] }
  0x17   : > { %v264_v24 = vld [vmem:[#allocation2 + $0x8] sm:$0xf]  ;;  %v248_v7 = vcombine.low %v703_v17, %v703_v17 }
  0x18   : > { %v208_v33 = vld [vmem:[#allocation2 + $0x8] sm:$0xf] }
  0x19   : > { %275 = vrot.lane.b32.xlu1 %v274_v11, %s637_s27  ;;  %362 = vrot.lane.b32.xlu0 %v218_v13, %s638_s28  ;;  %v301_v51 = vld [vmem:[#allocation2 + $0x8] sm:$0xf] }
  0x1d   : > { %219 = vrot.lane.b32.xlu1 %v218_v13, %s639_s29  ;;  %302 = vrot.lane.b32.xlu0 %v218_v13, %s640_s30 }
  0x21   : > { %395 = vrot.lane.b32.xlu0 %v621_v14, %s641_s5  ;;  %393 = vrot.lane.b32.xlu1 %v689_v12, %s641_s5 }
  0x25   : > { %391 = vrot.lane.b32.xlu0 %v389_v15, %s641_s5  ;;  %254 = vrot.lane.b32.xlu1 %v623_v16, %s642_s6 }
  0x29   : > { %252 = vrot.lane.b32.xlu0 %v703_v17, %s642_s6 }
  0x87   : > { %v337_v18 = vpop.permute.xlu1 %336  ;;  %v407_v19 = vpop.permute.xlu0 %406 }
  0x88   : > { %v408_v21 = vrot.slane %v407_v19, 4  ;;  %v338_v39 = vrot.slane %v337_v18, 4 }
  0x8a   : > { %v413_v22 = vmul.f32 %v408_v21, %v405_v20  ;;  %v409_v31 = vsel %vm237_vm0, %v408_v21, %v407_v19  ;;  %v339_v49 = vsel %vm321_vm4, %v338_v39, %v337_v18  ;;  %v343_v56 = vmul.f32 %v338_v39, %v335_v48 }
  0x8b   : > { %v276_v23 = vpop.permute.xlu1 %275  ;;  %v363_v25 = vpop.permute.xlu0 %362  ;;  %v412_v37 = vmul.f32 %v409_v31, %v689_v12  ;;  %v342_v55 = vmul.f32 %v339_v49, %v689_v12 }
  0x8c   : > { %v277_v27 = vrot.slane %v276_v23, 4  ;;  %v364_v28 = vrot.slane %v363_v25, 4  ;;  %421 = vrot.lane.b32.xlu1 %v413_v22, %s639_s29  ;;  %v347_v61 = vcombine.low %v343_v56, %v343_v56 }
  0x8d   : > { %v416_v63 = vcombine.high %v412_v37, %v412_v37  ;;  %v346_v4 = vcombine.low %v342_v55, %v342_v55 }
  0x8e   : > { %v283_v29 = vmul.f32 %v277_v27, %v264_v24  ;;  %v369_v30 = vmul.f32 %v364_v28, %v361_v26  ;;  %v365_v40 = vsel %vm293_vm1, %v364_v28, %v363_v25  ;;  %v279_v50 = vsel %vm278_vm5, %v277_v27, %v276_v23 }
  0x8f   : > { %v220_v32 = vpop.permute.xlu1 %219  ;;  %v303_v34 = vpop.permute.xlu0 %302  ;;  %v368_v46 = vmul.f32 %v365_v40, %v689_v12  ;;  %v282_v57 = vmul.f32 %v279_v50, %v703_v17 }
  0x90   : > { %v221_v35 = vrot.slane %v220_v32, 4  ;;  %v304_v36 = vrot.slane %v303_v34, 4  ;;  %291 = vrot.lane.b32.xlu1 %v283_v29, %s638_s28  ;;  %377 = vrot.lane.b32.xlu0 %v369_v30, %s637_s27 }
  0x91   : > { %v372_v0 = vcombine.high %v368_v46, %v368_v46  ;;  %v286_v3 = vcombine.high %v282_v57, %v282_v57 }
  0x92   : > { %v227_v38 = vmul.f32 %v221_v35, %v208_v33  ;;  %v306_v41 = vsel %vm305_vm2, %v304_v36, %v303_v34  ;;  %v310_v58 = vmul.f32 %v304_v36, %v301_v51  ;;  %v223_v1 = vsel %vm222_vm7, %v221_v35, %v220_v32  ;;  %v200_v51 = vld [vmem:[%s776_s1] sm:$0xff] }
  0x93   : > { %v396_v42 = vpop.permute.xlu0 %395  ;;  %v394_v43 = vpop.permute.xlu1 %393  ;;  %v309_v47 = vmul.f32 %v306_v41, %v703_v17  ;;  %v226_v2 = vmul.f32 %v703_v17, %v223_v1 }
  0x94   : > { %417 = vrot.lane.b32.xlu0 %v412_v37, %s639_s29  ;;  %235 = vrot.lane.b32.xlu1 %v227_v38, %s636_s26  ;;  %v399_v45 = vsel %vm397_vm3, %v394_v43, %v396_v42  ;;  %v314_v62 = vcombine.low %v310_v58, %v310_v58 }
  0x95   : > { %403 = vst [vmem:[#allocation3 + $0x20] sm:$0xf0] %v399_v45  ;;  %v313_v5 = vcombine.low %v309_v47, %v309_v47  ;;  %v230_v6 = vcombine.high %v226_v2, %v226_v2 }
  0x97   : > { %v392_v52 = vpop.permute.xlu0 %391  ;;  %v255_v54 = vpop.permute.xlu1 %254 }
  0x98   : > { %317 = vrot.lane.b32.xlu0 %v309_v47, %s635_s25  ;;  %373 = vrot.lane.b32.xlu1 %v368_v46, %s637_s27  ;;  %v398_v53 = vsel %vm397_vm3, %v392_v52, %v394_v43 }
  0x99   : > { %402 = vst [vmem:[#allocation3 + $0x8] sm:$0xf0] %v398_v53 }
  0x9b   : > { %v728_v59 = vpop.permute.xlu0 %252 }
  0x9c   : > { %287 = vrot.lane.b32.xlu0 %v282_v57, %s638_s28  ;;  %350 = vrot.lane.b32.xlu1 %v342_v55, %s640_s30  ;;  %v258_v60 = vsel %vm256_vm6, %v728_v59, %v255_v54 }
  0x9d   : > { %262 = vst [vmem:[#allocation3] sm:$0xf0] %v258_v60 }
  0xa0   : > { %352 = vrot.lane.b32.xlu0 %v347_v61, %s640_s30  ;;  %319 = vrot.lane.b32.xlu1 %v314_v62, %s635_s25 }
  0xa4   : > { %419 = vrot.lane.b32.xlu0 %v416_v63, %s639_s29  ;;  %375 = vrot.lane.b32.xlu1 %v372_v0, %s637_s27 }
  0xa8   : > { %289 = vrot.lane.b32.xlu0 %v286_v3, %s638_s28  ;;  %348 = vrot.lane.b32.xlu1 %v346_v4, %s640_s30 }
  0xac   : > { %315 = vrot.lane.b32.xlu1 %v313_v5, %s635_s25  ;;  %233 = vrot.lane.b32.xlu0 %v230_v6, %s636_s26 }
  0xb0   : > { %250 = vrot.lane.b32.xlu1 %v248_v7, %s642_s6  ;;  %231 = vrot.lane.b32.xlu0 %v226_v2, %s636_s26 }
  0xb4   : > { %441 = vperm.xlu0 %620, %v201_v9  }
  0xfe   : > { %v422_v10 = vpop.permute.xlu1 %421 }
 0x102   : > { %v292_v11 = vpop.permute.xlu1 %291  ;;  %v378_v12 = vpop.permute.xlu0 %377 }
 0x106   : > { %v418_v13 = vpop.permute.xlu0 %417  ;;  %v236_v14 = vpop.permute.xlu1 %235 }
 0x10a   : > { %v318_v15 = vpop.permute.xlu0 %317  ;;  %v374_v16 = vpop.permute.xlu1 %373 }
 0x10e   : > { %v288_v17 = vpop.permute.xlu0 %287  ;;  %v351_v18 = vpop.permute.xlu1 %350 }
 0x112   : > { %v353_v19 = vpop.permute.xlu0 %352  ;;  %v320_v20 = vpop.permute.xlu1 %319 }
 0x113   : > { %v355_v21 = vsel %vm305_vm2, %v351_v18, %v353_v19  ;;  %v323_v22 = vsel %vm321_vm4, %v318_v15, %v320_v20 }
 0x114   : > { %359 = vst [vmem:[#allocation3 + $0x28] sm:$0xf0] %v355_v21  ;;  %327 = vst [vmem:[#allocation3 + $0x10] sm:$0xf0] %v323_v22 }
 0x116   : > { %v420_v23 = vpop.permute.xlu0 %419  ;;  %v376_v24 = vpop.permute.xlu1 %375 }
 0x117   : > { %v423_v25 = vsel %vm222_vm7, %v418_v13, %v420_v23  ;;  %v424_v26 = vsel %vm222_vm7, %v420_v23, %v422_v10  ;;  %v379_v27 = vsel %vm278_vm5, %v374_v16, %v376_v24  ;;  %v380_v28 = vsel %vm278_vm5, %v376_v24, %v378_v12 }
 0x118   : > { %427 = vst [vmem:[#allocation3 + $0x40] sm:$0xf] %v423_v25  ;;  %428 = vst [vmem:[#allocation3 + $0x38] sm:$0xf] %v424_v26 }
 0x119   : > { %383 = vst [vmem:[#allocation3 + $0x8] sm:$0xf] %v379_v27  ;;  %384 = vst [vmem:[#allocation3 + $0x20] sm:$0xf] %v380_v28 }
 0x11a   : > { %v290_v29 = vpop.permute.xlu0 %289  ;;  %v349_v30 = vpop.permute.xlu1 %348 }
 0x11b   : > { %v294_v31 = vsel %vm293_vm1, %v288_v17, %v290_v29  ;;  %v295_v32 = vsel %vm293_vm1, %v290_v29, %v292_v11  ;;  %v354_v33 = vsel %vm305_vm2, %v349_v30, %v351_v18  ;;  %v434_v46 = vld [vmem:[#allocation3 + $0x28] sm:$0xff] }
 0x11c   : > { %298 = vst [vmem:[#allocation3 + $0x18] sm:$0xf] %v294_v31  ;;  %299 = vst [vmem:[#allocation3 + $0x10] sm:$0xf] %v295_v32 }
 0x11d   : > { %358 = vst [vmem:[#allocation3 + $0x48] sm:$0xf0] %v354_v33 }
 0x11e   : > { %v316_v34 = vpop.permute.xlu1 %315  ;;  %v234_v35 = vpop.permute.xlu0 %233 }
 0x11f   : > { %v322_v36 = vsel %vm321_vm4, %v316_v34, %v318_v15  ;;  %v239_v37 = vsel %vm237_vm0, %v234_v35, %v236_v14  ;;  %v438_v38 = vld [vmem:[#allocation3 + $0x38] sm:$0xf]  ;;  %v437_v39 = vld [vmem:[#allocation3 + $0x40] sm:$0xf] }
 0x120   : > { %326 = vst [vmem:[#allocation3 + $0x18] sm:$0xf0] %v322_v36  ;;  %243 = vst [vmem:[#allocation3] sm:$0xf] %v239_v37  ;;  %595 = vmatprep.subr.msk.mxu0 %vm448_vm8, %v438_v38  ;;  %v436_v40 = vld [vmem:[#allocation3 + $0x20] sm:$0xff]  ;;  %v435_v43 = vld [vmem:[#allocation3 + $0x8] sm:$0xff] }
 0x121   : > { %596 = vmatpush1.msk.msra.mxu0 %vm448_vm8, %v437_v39 }
 0x122   : > { %479 = vmatprep.subr.mxu0 %v436_v40  ;;  %v251_v41 = vpop.permute.xlu1 %250  ;;  %v232_v42 = vpop.permute.xlu0 %231 }
 0x123   : > { %v257_v44 = vsel %vm256_vm6, %v251_v41, %v728_v59  ;;  %v238_v45 = vsel %vm237_vm0, %v232_v42, %v234_v35  ;;  %480 = vmatpush1.msra.mxu0 %v435_v43  ;;  %v432_v48 = vld [vmem:[#allocation3 + $0x10] sm:$0xff] }
 0x124   : > { %v433_v47 = vld [vmem:[#allocation3 + $0x48] sm:$0xff]  ;;  %261 = vst [vmem:[#allocation3 + $0x30] sm:$0xf0] %v257_v44  ;;  %242 = vst [vmem:[#allocation3 + $0x30] sm:$0xf] %v238_v45  ;;  %481 = vmatprep.subr.mxu0 %v434_v46 }
 0x125   : > { %482 = vmatpush1.msra.mxu0 %v433_v47 }
 0x126   : > { %483 = vmatprep.subr.mxu0 %v432_v48 }
 0x127   : > { %v431_v49 = vld [vmem:[#allocation3 + $0x18] sm:$0xff]  ;;  %v430_v50 = vld [vmem:[#allocation3] sm:$0xff] }
 0x128   : > { %484 = vmatpush1.msra.mxu0 %v431_v49 }
 0x129   : > { %485 = vmatprep.subr.mxu0 %v430_v50 }
 0x12b   : > { %v429_v52 = vld [vmem:[#allocation3 + $0x30] sm:$0xff] }
 0x12c   : > { %486 = vmatpush1.msra.mxu0 %v429_v52 }
 0x12d   : > { %597 = vmatmul.mubr.msk.f32.vlgmr.msra.gmra.mxu0 %vm444_vm9, %v200_v51 }
 0x12f   : > { %v442_v53 = vpop.permute.xlu0 %441 }
 0x1ed   : > { %v521_v54 = vpop.f32.mrf.mxu0 }
 0x1ee   : > { %v522_v55 = vadd.f32 %v521_v54, %v442_v53 }
 0x1ef   : > { %v523_v56 = vpop.f32.mrf.mxu0 }
 0x1f0   : > { %v526_v57 = vmax.f32 %v522_v55, 0.0  ;;  %v524_v58 = vadd.f32 %v523_v56, %v442_v53 }
 0x1f2   : > { %528 = vst [vmem:[%s197_s14] sm:$0xff] %v526_v57  ;;  %v527_v59 = vmax.f32 %v524_v58, 0.0 }
 0x1f4   : > { %529 = vst [vmem:[%s197_s14 + $0x8] sm:$0xff] %v527_v59 }
 0x1f5 PF: > { %s14_s15 = sadd.s32 1, %s632_s15  }
 0x1f6   : > { %p11_p4 = scmp.ge.s32.totalorder %s14_s15, 4  }
 0x1f8   :  { %13 = sbr.rel (!%p11_p4) target bundleno = 1 (0x1), region = 67 }

</bundles_post_ra>
